<compile_context>
chip_gen: v7x
topology: tpu7x:2x2x1
jax: 0.10.0
libtpu: 0.0.40
codegen_flags: <defaults>
</compile_context>

<pallas_src>
import functools

import jax
import jax.numpy as jnp
from jax.experimental import pallas as pl
from jax.experimental.pallas import tpu as pltpu

LANE = 128


def _round_up(n, m):
    return ((n + m - 1) // m) * m


def _make_mlp_kernel(h1p, h2p, cp):
    """Kernel closure over the padded hidden/output widths (for bias slicing)."""

    def mlp_kernel(x_ref, w1_ref, w2_ref, w3_ref, bias_ref, o_ref):
        b1 = bias_ref[0:1, 0:h1p]
        b2 = bias_ref[1:2, 0:h2p]
        b3 = bias_ref[2:3, 0:cp]
        # fc1 + ReLU  (weights pre-transposed to (in, out): no in-kernel transpose)
        h1 = jnp.dot(x_ref[...], w1_ref[...], preferred_element_type=jnp.float32)
        h1 = jnp.maximum(h1 + b1, 0.0)            # bias + ReLU in f32 (v5e-safe)
        # dropout2 (p=0.5) -> identity at inference time (model.eval() semantics)
        # fc2 + ReLU
        h2 = jnp.dot(h1.astype(w2_ref.dtype), w2_ref[...],
                     preferred_element_type=jnp.float32)
        h2 = jnp.maximum(h2 + b2, 0.0)
        # fc3
        out = jnp.dot(h2.astype(w3_ref.dtype), w3_ref[...],
                      preferred_element_type=jnp.float32)
        o_ref[...] = (out + b3).astype(o_ref.dtype)

    return mlp_kernel


def prepare_params(w1, b1, w2, b2, w3, b3, *, compute_dtype=jnp.bfloat16):
    """One-time parameter prep (do this at model init, NOT per forward call).

    PyTorch nn.Linear layout (out, in) -> transposed to (in, out), output dims
    zero-padded to multiples of 128 (lane-dense), cast to the MXU compute dtype.
    Biases are packed into a single (8, Lmax) f32 block.
    """
    h1_f, in_features = w1.shape
    h2_f = w2.shape[0]
    num_classes = w3.shape[0]

    h1p = _round_up(h1_f, LANE)
    h2p = _round_up(h2_f, LANE)
    cp = _round_up(num_classes, LANE)

    def pad2(a, rows, cols):
        return jnp.pad(a, ((0, rows - a.shape[0]), (0, cols - a.shape[1])))

    # Note: w1t's sublane (K) dim stays at the true in_features -- no K padding.
    w1t = pad2(w1.T, in_features, h1p).astype(compute_dtype)
    w2t = pad2(w2.T, h1p, h2p).astype(compute_dtype)
    w3t = pad2(w3.T, h2p, cp).astype(compute_dtype)

    lmax = max(h1p, h2p, cp)
    bias_pack = jnp.zeros((8, lmax), jnp.float32)
    bias_pack = (bias_pack
                 .at[0, :h1_f].set(b1.astype(jnp.float32))
                 .at[1, :h2_f].set(b2.astype(jnp.float32))
                 .at[2, :num_classes].set(b3.astype(jnp.float32)))

    dims = (in_features, h1p, h2p, cp, num_classes)
    return (w1t, w2t, w3t, bias_pack, dims)


def neural_net_forward(x, params, *, block_m=512, out_dtype=jnp.float32):
    """Fused MLP forward using pre-prepped params from prepare_params()."""
    w1t, w2t, w3t, bias_pack, dims = params
    in_features, h1p, h2p, cp, num_classes = dims
    compute_dtype = w1t.dtype

    batch = x.shape[0]
    assert x.shape[1] == in_features

    # Batch tiling: single grid step for small batches (per-step overhead >> work);
    # 512-row tiles (parallel axis; shards across v7x's two TensorCores) when large.
    if batch <= 1024:
        tm = _round_up(batch, 8)
    else:
        tm = block_m
    bp = _round_up(batch, tm)
    grid_m = bp // tm

    xp = x if bp == batch else jnp.pad(x, ((0, bp - batch), (0, 0)))
    xp = xp.astype(compute_dtype)

    itemsize = jnp.dtype(compute_dtype).itemsize
    cost = pl.CostEstimate(
        flops=2 * bp * (in_features * h1p + h1p * h2p + h2p * cp),
        transcendentals=0,
        bytes_accessed=(xp.size + w1t.size + w2t.size + w3t.size) * itemsize
                       + bias_pack.size * 4
                       + bp * cp * jnp.dtype(out_dtype).itemsize,
    )

    full = lambda a: pl.BlockSpec(a.shape, lambda i: (0, 0))

    out_padded = pl.pallas_call(
        _make_mlp_kernel(h1p, h2p, cp),
        out_shape=jax.ShapeDtypeStruct((bp, cp), out_dtype),
        grid=(grid_m,),
        in_specs=[
            pl.BlockSpec((tm, in_features), lambda i: (i, 0)),  # batch-tiled x
            full(w1t), full(w2t), full(w3t), full(bias_pack),
        ],
        out_specs=pl.BlockSpec((tm, cp), lambda i: (i, 0)),
        compiler_params=pltpu.CompilerParams(
            dimension_semantics=("parallel",)),
        cost_estimate=cost,
    )(xp, w1t, w2t, w3t, bias_pack)

    return out_padded[:batch, :num_classes]


def reference_forward(x, w1, b1, w2, b2, w3, b3):
    h = jnp.maximum(x @ w1.T + b1, 0.0)
    h = jnp.maximum(h @ w2.T + b2, 0.0)
    return h @ w3.T + b3


if __name__ == "__main__":
    # Module hyperparameters from the spec; batch chosen to fill MXU rows while
    # still taking the single-grid-step (no batch tiling) fast path.
    batch = 256
    input_size = 32
    hidden_size_list = [64, 32]
    num_classes = 16

    key = jax.random.PRNGKey(0)
    kx, k1, k2, k3, k4, k5, k6 = jax.random.split(key, 7)

    x = jax.random.normal(kx, (batch, input_size), jnp.float32)
    # PyTorch nn.Linear layout: W is (out_features, in_features)
    w1 = jax.random.normal(k1, (hidden_size_list[0], input_size), jnp.float32) * 0.1
    b1 = jax.random.normal(k2, (hidden_size_list[0],), jnp.float32) * 0.1
    w2 = jax.random.normal(k3, (hidden_size_list[1], hidden_size_list[0]), jnp.float32) * 0.1
    b2 = jax.random.normal(k4, (hidden_size_list[1],), jnp.float32) * 0.1
    w3 = jax.random.normal(k5, (num_classes, hidden_size_list[1]), jnp.float32) * 0.1
    b3 = jax.random.normal(k6, (num_classes,), jnp.float32) * 0.1

    ref = reference_forward(x, w1, b1, w2, b2, w3, b3)

    # Default (fast) path: one-time param prep, bf16 MXU inputs, f32 accumulation.
    params_bf16 = jax.tree_util.tree_map(
        jax.block_until_ready,
        prepare_params(w1, b1, w2, b2, w3, b3, compute_dtype=jnp.bfloat16))
    fwd = jax.jit(functools.partial(neural_net_forward, params=params_bf16))
    out = jax.block_until_ready(fwd(x))
    assert out.shape == (batch, num_classes)
    assert jnp.allclose(out, ref, atol=5e-2, rtol=5e-2), "bf16 path mismatch vs reference"

    # Strict-precision path (f32 operands) for tight functional verification.
    params_f32 = prepare_params(w1, b1, w2, b2, w3, b3, compute_dtype=jnp.float32)
    out_f32 = jax.block_until_ready(neural_net_forward(x, params_f32))
    assert jnp.allclose(out_f32, ref, atol=1e-4, rtol=1e-4), "f32 path mismatch vs reference"

    print("KERNEL_OK")
</pallas_src>

<mosaic_0001>
module attributes {stable_mosaic.version = 11 : i64} {
  func.func @mlp_kernel(%arg0: i32, %arg1: memref<256x32xbf16, #tpu.memory_space<vmem>>, %arg2: memref<32x128xbf16, #tpu.memory_space<vmem>>, %arg3: memref<128x128xbf16, #tpu.memory_space<vmem>>, %arg4: memref<128x128xbf16, #tpu.memory_space<vmem>>, %arg5: memref<8x128xf32, #tpu.memory_space<vmem>>, %arg6: memref<256x128xf32, #tpu.memory_space<vmem>>) attributes {dimension_semantics = [#tpu.dimension_semantics<parallel>], iteration_bounds = array<i64: 1>, scalar_prefetch = 0 : i64, scratch_operands = 0 : i64, tpu.core_type = #tpu.core_type<tc>, window_params = [{transform_indices = @transform_0, window_bounds = array<i64: 256, 32>}, {pipeline_mode = #tpu.pipeline_mode<synchronous>, transform_indices = @transform_1, window_bounds = array<i64: 32, 128>}, {pipeline_mode = #tpu.pipeline_mode<synchronous>, transform_indices = @transform_2, window_bounds = array<i64: 128, 128>}, {pipeline_mode = #tpu.pipeline_mode<synchronous>, transform_indices = @transform_3, window_bounds = array<i64: 128, 128>}, {pipeline_mode = #tpu.pipeline_mode<synchronous>, transform_indices = @transform_4, window_bounds = array<i64: 8, 128>}, {transform_indices = @transform_5, window_bounds = array<i64: 256, 128>}]} {
    %c0 = arith.constant 0 : index
    %c0_0 = arith.constant 0 : index
    %0 = vector.load %arg5[%c0, %c0_0] : memref<8x128xf32, #tpu.memory_space<vmem>>, vector<1x128xf32>
    %c1 = arith.constant 1 : index
    %c0_1 = arith.constant 0 : index
    %1 = vector.load %arg5[%c1, %c0_1] : memref<8x128xf32, #tpu.memory_space<vmem>>, vector<1x128xf32>
    %c2 = arith.constant 2 : index
    %c0_2 = arith.constant 0 : index
    %2 = vector.load %arg5[%c2, %c0_2] : memref<8x128xf32, #tpu.memory_space<vmem>>, vector<1x128xf32>
    %c0_3 = arith.constant 0 : index
    %c0_4 = arith.constant 0 : index
    %3 = vector.load %arg1[%c0_3, %c0_4] : memref<256x32xbf16, #tpu.memory_space<vmem>>, vector<256x32xbf16>
    %c0_5 = arith.constant 0 : index
    %c0_6 = arith.constant 0 : index
    %4 = vector.load %arg2[%c0_5, %c0_6] : memref<32x128xbf16, #tpu.memory_space<vmem>>, vector<32x128xbf16>
    %cst = arith.constant dense<0.000000e+00> : vector<256x128xf32>
    %5 = tpu.matmul %3, %4, %cst {dimension_numbers = #tpu.dot_dimension_numbers<[1], [0], [0], [1], [0, 0, 1, 1], [], []>} : vector<256x32xbf16>, vector<32x128xbf16>, vector<256x128xf32> -> vector<256x128xf32>
    %6 = vector.broadcast %0 : vector<1x128xf32> to vector<256x128xf32>
    %7 = arith.addf %5, %6 : vector<256x128xf32>
    %cst_7 = arith.constant 0.000000e+00 : f32
    %8 = vector.broadcast %cst_7 : f32 to vector<256x128xf32>
    %9 = arith.maximumf %7, %8 : vector<256x128xf32>
    %10 = arith.truncf %9 : vector<256x128xf32> to vector<256x128xbf16>
    %c0_8 = arith.constant 0 : index
    %c0_9 = arith.constant 0 : index
    %11 = vector.load %arg3[%c0_8, %c0_9] : memref<128x128xbf16, #tpu.memory_space<vmem>>, vector<128x128xbf16>
    %cst_10 = arith.constant dense<0.000000e+00> : vector<256x128xf32>
    %12 = tpu.matmul %10, %11, %cst_10 {dimension_numbers = #tpu.dot_dimension_numbers<[1], [0], [0], [1], [0, 0, 1, 1], [], []>} : vector<256x128xbf16>, vector<128x128xbf16>, vector<256x128xf32> -> vector<256x128xf32>
    %13 = vector.broadcast %1 : vector<1x128xf32> to vector<256x128xf32>
    %14 = arith.addf %12, %13 : vector<256x128xf32>
    %cst_11 = arith.constant 0.000000e+00 : f32
    %15 = vector.broadcast %cst_11 : f32 to vector<256x128xf32>
    %16 = arith.maximumf %14, %15 : vector<256x128xf32>
    %17 = arith.truncf %16 : vector<256x128xf32> to vector<256x128xbf16>
    %c0_12 = arith.constant 0 : index
    %c0_13 = arith.constant 0 : index
    %18 = vector.load %arg4[%c0_12, %c0_13] : memref<128x128xbf16, #tpu.memory_space<vmem>>, vector<128x128xbf16>
    %cst_14 = arith.constant dense<0.000000e+00> : vector<256x128xf32>
    %19 = tpu.matmul %17, %18, %cst_14 {dimension_numbers = #tpu.dot_dimension_numbers<[1], [0], [0], [1], [0, 0, 1, 1], [], []>} : vector<256x128xbf16>, vector<128x128xbf16>, vector<256x128xf32> -> vector<256x128xf32>
    %20 = vector.broadcast %2 : vector<1x128xf32> to vector<256x128xf32>
    %21 = arith.addf %19, %20 : vector<256x128xf32>
    %c0_15 = arith.constant 0 : index
    %c0_16 = arith.constant 0 : index
    %22 = vector.load %arg6[%c0_15, %c0_16] : memref<256x128xf32, #tpu.memory_space<vmem>>, vector<256x128xf32>
    tpu.vector_store %arg6[%c0_15, %c0_16], %21 {strides = array<i32>} : memref<256x128xf32, #tpu.memory_space<vmem>>, vector<256x128xf32>,
    return
  }
  func.func @transform_0(%arg0: i32) -> (i32, i32) {
    %c0_i32 = arith.constant 0 : i32
    %c0_i32_0 = arith.constant 0 : i32
    return %arg0, %c0_i32 : i32, i32
  }
  func.func @transform_1(%arg0: i32) -> (i32, i32) {
    %c0_i32 = arith.constant 0 : i32
    %c0_i32_0 = arith.constant 0 : i32
    %c0_i32_1 = arith.constant 0 : i32
    return %c0_i32, %c0_i32_0 : i32, i32
  }
  func.func @transform_2(%arg0: i32) -> (i32, i32) {
    %c0_i32 = arith.constant 0 : i32
    %c0_i32_0 = arith.constant 0 : i32
    %c0_i32_1 = arith.constant 0 : i32
    return %c0_i32, %c0_i32_0 : i32, i32
  }
  func.func @transform_3(%arg0: i32) -> (i32, i32) {
    %c0_i32 = arith.constant 0 : i32
    %c0_i32_0 = arith.constant 0 : i32
    %c0_i32_1 = arith.constant 0 : i32
    return %c0_i32, %c0_i32_0 : i32, i32
  }
  func.func @transform_4(%arg0: i32) -> (i32, i32) {
    %c0_i32 = arith.constant 0 : i32
    %c0_i32_0 = arith.constant 0 : i32
    %c0_i32_1 = arith.constant 0 : i32
    return %c0_i32, %c0_i32_0 : i32, i32
  }
  func.func @transform_5(%arg0: i32) -> (i32, i32) {
    %c0_i32 = arith.constant 0 : i32
    %c0_i32_0 = arith.constant 0 : i32
    return %arg0, %c0_i32 : i32, i32
  }
}

</mosaic_0001>

<bundles_post_ra>
// kernel: neural_net_forward.1
= control target key start
LH: loop header
LB: loop body
LE: loop exit
PB: predicated region body
PF: predicated region fallthrough
CT: control target
= control target key end

     0   :  { %vm156_vm0 = vcmask 261120   ;;  %s1606_s1 = inlined_call_operand.vmem [shape: bf16[32,128], index: 1, kind: input, shape index: {}]   ;;  %s1607_s0 = inlined_call_operand.vmem [shape: bf16[256,32], index: 0, kind: input, shape index: {}]   ;;  %s1608_s2 = inlined_call_operand.vmem [shape: bf16[128,128], index: 2, kind: input, shape index: {}]   ;;  %s1609_s3 = inlined_call_operand.vmem [shape: bf16[128,128], index: 3, kind: input, shape index: {}]   ;;  %s1610_s4 = inlined_call_operand.vmem [shape: f32[8,128], index: 4, kind: input, shape index: {}]   ;;  %s1611_s5 = inlined_call_operand.vmem [shape: f32[256,128], index: 5, kind: output, shape index: {}]  }
   0x1   :  { %v1211_v0 = vld [vmem:[%s1606_s1] sm:$0xff]   ;;  %v1212_v1 = vld [vmem:[%s1606_s1 + $0x8] sm:$0xff]   ;;  %v1215_v4 = vld [vmem:[%s1607_s0 + $0x10] sm:$0xff]  }
   0x2   :  { %1075 = vmatprep.subr.bf16.mxu0 %v1211_v0  ;;  %v1213_v2 = vld [vmem:[%s1607_s0] sm:$0xff]   ;;  %1207 = vmatprep.subr.bf16.mxu1 %v1211_v0  ;;  %v1214_v3 = vld [vmem:[%s1607_s0 + $0x8] sm:$0xff]   ;;  %v1223_v7 = vld [vmem:[%s1607_s0 + $0x50] sm:$0xff]  }
   0x3   :  { %1076 = vmatpush3.bf16.msra.mxu0 %v1211_v0  ;;  %1209 = vmatpush3.bf16.msra.mxu1 %v1211_v0  ;;  %v1221_v5 = vld [vmem:[%s1607_s0 + $0x40] sm:$0xff]   ;;  %v1222_v6 = vld [vmem:[%s1607_s0 + $0x48] sm:$0xff]   ;;  %v1216_v8 = vld [vmem:[%s1607_s0 + $0x18] sm:$0xff]  }
   0x4   :  { %1077 = vmatprep.subr.bf16.mxu0 %v1212_v1  ;;  %1079 = vmatprep.mubr.msk.bf16.mxu0 %vm156_vm0, %v1213_v2  ;;  %v1217_v9 = vld [vmem:[%s1607_s0 + $0x20] sm:$0xff]   ;;  %v1224_v10 = vld [vmem:[%s1607_s0 + $0x58] sm:$0xff]   ;;  %v1230_v13 = vld [vmem:[%s1608_s2 + $0x8] sm:$0xff]  }
   0x5   :  { %1208 = vmatprep.subr.bf16.mxu1 %v1212_v1  ;;  %1095 = vmatprep.mubr.msk.bf16.mxu1 %vm156_vm0, %v1221_v5  ;;  %v1225_v11 = vld [vmem:[%s1607_s0 + $0x60] sm:$0xff]   ;;  %v1218_v14 = vld [vmem:[%s1607_s0 + $0x28] sm:$0xff]   ;;  %v1219_v15 = vld [vmem:[%s1607_s0 + $0x30] sm:$0xff]  }
   0x6   :  { %v1229_v12 = vld [vmem:[%s1608_s2] sm:$0xff]   ;;  %v1231_v16 = vld [vmem:[%s1608_s2 + $0x10] sm:$0xff]   ;;  %v1226_v17 = vld [vmem:[%s1607_s0 + $0x68] sm:$0xff]  }
   0x7   :  { %1078 = vmatpush3.bf16.msra.mxu0 %v1212_v1  ;;  %1210 = vmatpush3.bf16.msra.mxu1 %v1212_v1  ;;  %v1227_v18 = vld [vmem:[%s1607_s0 + $0x70] sm:$0xff]   ;;  %v1232_v19 = vld [vmem:[%s1608_s2 + $0x18] sm:$0xff]   ;;  %v1233_v21 = vld [vmem:[%s1608_s2 + $0x20] sm:$0xff]  }
   0x8   :  { %1111 = vmatprep.subr.bf16.mxu1 %v1229_v12  ;;  %v1220_v20 = vld [vmem:[%s1607_s0 + $0x38] sm:$0xff]   ;;  %v1234_v23 = vld [vmem:[%s1608_s2 + $0x28] sm:$0xff]   ;;  %v1235_v24 = vld [vmem:[%s1608_s2 + $0x30] sm:$0xff]  }
   0x9   :  { %v1228_v22 = vld [vmem:[%s1607_s0 + $0x78] sm:$0xff]   ;;  %v1237_v26 = vld [vmem:[%s1609_s3] sm:$0xff]   ;;  %v1238_v27 = vld [vmem:[%s1609_s3 + $0x8] sm:$0xff]  }
   0xa   :  { %1080 = vmatmul.mubr.msk.bf16.vlgmr.msra.gmra.mrb[0].mxu0 %vm156_vm0, %v1214_v3  ;;  %1096 = vmatmul.mubr.msk.bf16.vlgmr.msra.gmra.mrb[0].mxu1 %vm156_vm0, %v1222_v6  ;;  %v1236_v25 = vld [vmem:[%s1608_s2 + $0x38] sm:$0xff]   ;;  %v1239_v28 = vld [vmem:[%s1609_s3 + $0x10] sm:$0xff]   ;;  %v1241_v30 = vld [vmem:[%s1609_s3 + $0x20] sm:$0xff]  }
   0xb   :  { %1083 = vmatprep.mubr.msk.bf16.mxu0 %vm156_vm0, %v1215_v4  ;;  %1099 = vmatprep.mubr.msk.bf16.mxu1 %vm156_vm0, %v1223_v7  ;;  %v1240_v29 = vld [vmem:[%s1609_s3 + $0x18] sm:$0xff]   ;;  %v1242_v31 = vld [vmem:[%s1609_s3 + $0x28] sm:$0xff]   ;;  %v1390_v32 = vld [vmem:[%s1610_s4] ss:$0 sm:$0xff] }
   0xc   :  { %1112 = vmatpush3.bf16.msra.mxu1 %v1229_v12  ;;  %1159 = vmatprep.subr.bf16.mxu0 %v1237_v26 }
   0xd   :  { %1113 = vmatprep.subr.bf16.mxu1 %v1230_v13  ;;  %1160 = vmatpush3.bf16.msra.mxu0 %v1237_v26 }
   0xe   :  { %1161 = vmatprep.subr.bf16.mxu0 %v1238_v27 }
  0x10   :  { %1114 = vmatpush3.bf16.msra.mxu1 %v1230_v13 }
  0x11   :  { %1115 = vmatprep.subr.bf16.mxu1 %v1231_v16  ;;  %1162 = vmatpush3.bf16.msra.mxu0 %v1238_v27 }
  0x12   :  { %1084 = vmatmul.mubr.msk.bf16.gmra.mrb[4].mxu0 %vm156_vm0, %v1216_v8  ;;  %1100 = vmatmul.mubr.msk.bf16.gmra.mrb[4].mxu1 %vm156_vm0, %v1224_v10 }
  0x13   :  { %1087 = vmatprep.mubr.msk.bf16.mxu0 %vm156_vm0, %v1217_v9  ;;  %1103 = vmatprep.mubr.msk.bf16.mxu1 %vm156_vm0, %v1225_v11 }
  0x14   :  { %1116 = vmatpush3.bf16.msra.mxu1 %v1231_v16  ;;  %1163 = vmatprep.subr.bf16.mxu0 %v1239_v28 }
  0x15   :  { %1117 = vmatprep.subr.bf16.mxu1 %v1232_v19  ;;  %1164 = vmatpush3.bf16.msra.mxu0 %v1239_v28 }
  0x16   :  { %1165 = vmatprep.subr.bf16.mxu0 %v1240_v29 }
  0x18   :  { %1118 = vmatpush3.bf16.msra.mxu1 %v1232_v19 }
  0x19   :  { %1119 = vmatprep.subr.bf16.mxu1 %v1233_v21  ;;  %1166 = vmatpush3.bf16.msra.mxu0 %v1240_v29 }
  0x1a   :  { %1088 = vmatmul.mubr.msk.bf16.gmra.mrb[8].mxu0 %vm156_vm0, %v1218_v14  ;;  %1104 = vmatmul.mubr.msk.bf16.gmra.mrb[8].mxu1 %vm156_vm0, %v1226_v17 }
  0x1b   :  { %1091 = vmatprep.mubr.msk.bf16.mxu0 %vm156_vm0, %v1219_v15  ;;  %1107 = vmatprep.mubr.msk.bf16.mxu1 %vm156_vm0, %v1227_v18 }
  0x1c   :  { %1120 = vmatpush3.bf16.msra.mxu1 %v1233_v21  ;;  %1167 = vmatprep.subr.bf16.mxu0 %v1241_v30 }
  0x1d   :  { %1121 = vmatprep.subr.bf16.mxu1 %v1234_v23  ;;  %1168 = vmatpush3.bf16.msra.mxu0 %v1241_v30 }
  0x1e   :  { %1169 = vmatprep.subr.bf16.mxu0 %v1242_v31 }
  0x20   :  { %1122 = vmatpush3.bf16.msra.mxu1 %v1234_v23 }
  0x21   :  { %1123 = vmatprep.subr.bf16.mxu1 %v1235_v24  ;;  %1170 = vmatpush3.bf16.msra.mxu0 %v1242_v31 }
  0x22   :  { %1092 = vmatmul.mubr.msk.bf16.gmra.mrb[12].mxu0 %vm156_vm0, %v1220_v20  ;;  %1108 = vmatmul.mubr.msk.bf16.gmra.mrb[12].mxu1 %vm156_vm0, %v1228_v22 }
  0x24   :  { %1124 = vmatpush3.bf16.msra.mxu1 %v1235_v24 }
  0x25   :  { %1125 = vmatprep.subr.bf16.mxu1 %v1236_v25 }
  0x28   :  { %1126 = vmatpush3.bf16.msra.mxu1 %v1236_v25 }
  0xdd   :  { %v1081_v33 = vpop.f32.mrb[0].mxu0  ;;  %v1097_v40 = vpop.f32.mrb[0].mxu1 }
  0xde   :  { %v248_v34 = vadd.f32 %v1081_v33, %v1390_v32  ;;  %v239_v35 = vpop.f32.mrb[1].mxu0  ;;  %v312_v42 = vadd.f32 %v1097_v40, %v1390_v32  ;;  %v303_v43 = vpop.f32.mrb[1].mxu1 }
  0xdf   :  { %v240_v36 = vadd.f32 %v1390_v32, %v239_v35  ;;  %v1082_v37 = vpop.f32.mrb[2].mxu0  ;;  %v304_v46 = vadd.f32 %v1390_v32, %v303_v43  ;;  %v1098_v47 = vpop.f32.mrb[2].mxu1 }
  0xe0   :  { %v251_v38 = vadd.f32 %v1082_v37, %v1390_v32  ;;  %v242_v39 = vpop.f32.mrb[3].mxu0  ;;  %v368_v44 = vmax.f32 %v248_v34, 0.0  ;;  %v384_v50 = vmax.f32 %v312_v42, 0.0  ;;  %v315_v51 = vadd.f32 %v1098_v47, %v1390_v32  ;;  %v306_v52 = vpop.f32.mrb[3].mxu1 }
  0xe1   :  { %v243_v41 = vadd.f32 %v1390_v32, %v242_v39  ;;  %v366_v48 = vmax.f32 %v240_v36, 0.0  ;;  %v382_v54 = vmax.f32 %v304_v46, 0.0  ;;  %v307_v55 = vadd.f32 %v1390_v32, %v306_v52 }
  0xe2   :  { %v369_v45 = vmax.f32 %v251_v38, 0.0  ;;  %v385_v58 = vmax.f32 %v315_v51, 0.0 }
  0xe3   :  { %v367_v49 = vmax.f32 %v243_v41, 0.0  ;;  %v383_v61 = vmax.f32 %v307_v55, 0.0 }
  0xe4   :  { %v399_v53 = vpack.c.bf16 %v369_v45, %v368_v44  ;;  %v1402_v0 = vpack.c.bf16 %v385_v58, %v384_v50 }
  0xe5   :  { %v398_v56 = vpack.c.bf16 %v367_v49, %v366_v48  ;;  %v1085_v57 = vpop.f32.mrb[4].mxu0  ;;  %v1405_v3 = vpack.c.bf16 %v383_v61, %v382_v54  ;;  %v1101_v4 = vpop.f32.mrb[4].mxu1 }
  0xe6   :  { %v264_v59 = vadd.f32 %v1085_v57, %v1390_v32  ;;  %v255_v60 = vpop.f32.mrb[5].mxu0  ;;  %v328_v6 = vadd.f32 %v1101_v4, %v1390_v32  ;;  %v319_v7 = vpop.f32.mrb[5].mxu1 }
  0xe7   :  { %v256_v62 = vadd.f32 %v1390_v32, %v255_v60  ;;  %v1086_v63 = vpop.f32.mrb[6].mxu0  ;;  %1127 = vmatprep.mubr.bf16.mxu1 %v398_v56  ;;  %v320_v10 = vadd.f32 %v1390_v32, %v319_v7  ;;  %v1102_v11 = vpop.f32.mrb[6].mxu1 }
  0xe8   :  { %v267_v1 = vadd.f32 %v1086_v63, %v1390_v32  ;;  %v258_v2 = vpop.f32.mrb[7].mxu0  ;;  %1128 = vmatmul.mubr.bf16.vlgmr.msra.gmra.mrb[16].mxu1 %v399_v53  ;;  %v372_v8 = vmax.f32 %v264_v59, 0.0  ;;  %v388_v14 = vmax.f32 %v328_v6, 0.0  ;;  %v331_v15 = vadd.f32 %v1102_v11, %v1390_v32  ;;  %v322_v16 = vpop.f32.mrb[7].mxu1 }
  0xe9   :  { %v259_v5 = vadd.f32 %v1390_v32, %v258_v2  ;;  %v370_v12 = vmax.f32 %v256_v62, 0.0  ;;  %v386_v18 = vmax.f32 %v320_v10, 0.0  ;;  %v323_v19 = vadd.f32 %v1390_v32, %v322_v16 }
  0xea   :  { %v373_v9 = vmax.f32 %v267_v1, 0.0  ;;  %v389_v22 = vmax.f32 %v331_v15, 0.0 }
  0xeb   :  { %v371_v13 = vmax.f32 %v259_v5, 0.0  ;;  %v387_v25 = vmax.f32 %v323_v19, 0.0 }
  0xec   :  { %v401_v17 = vpack.c.bf16 %v373_v9, %v372_v8  ;;  %v409_v28 = vpack.c.bf16 %v389_v22, %v388_v14 }
  0xed   :  { %v400_v20 = vpack.c.bf16 %v371_v13, %v370_v12  ;;  %v1089_v21 = vpop.f32.mrb[8].mxu0  ;;  %v408_v31 = vpack.c.bf16 %v387_v25, %v386_v18  ;;  %v1105_v33 = vpop.f32.mrb[8].mxu1 }
  0xee   :  { %v280_v23 = vadd.f32 %v1089_v21, %v1390_v32  ;;  %v271_v24 = vpop.f32.mrb[9].mxu0  ;;  %v344_v35 = vadd.f32 %v1105_v33, %v1390_v32  ;;  %v335_v36 = vpop.f32.mrb[9].mxu1 }
  0xef   :  { %v272_v26 = vadd.f32 %v1390_v32, %v271_v24  ;;  %v1090_v27 = vpop.f32.mrb[10].mxu0  ;;  %1131 = vmatprep.mubr.bf16.mxu1 %v400_v20  ;;  %v336_v39 = vadd.f32 %v1390_v32, %v335_v36  ;;  %v1106_v40 = vpop.f32.mrb[10].mxu1  ;;  %v1244_v20 = vld [vmem:[%s1609_s3 + $0x38] sm:$0xff]  }
  0xf0   :  { %v283_v29 = vadd.f32 %v1090_v27, %v1390_v32  ;;  %v274_v30 = vpop.f32.mrb[11].mxu0  ;;  %1132 = vmatmul.mubr.bf16.gmra.mrb[20].mxu1 %v401_v17  ;;  %v376_v37 = vmax.f32 %v280_v23, 0.0  ;;  %v392_v43 = vmax.f32 %v344_v35, 0.0  ;;  %v347_v44 = vadd.f32 %v1106_v40, %v1390_v32  ;;  %v338_v45 = vpop.f32.mrb[11].mxu1 }
  0xf1   :  { %v275_v34 = vadd.f32 %v1390_v32, %v274_v30  ;;  %v374_v41 = vmax.f32 %v272_v26, 0.0  ;;  %v390_v47 = vmax.f32 %v336_v39, 0.0  ;;  %v339_v48 = vadd.f32 %v1390_v32, %v338_v45 }
  0xf2   :  { %v377_v38 = vmax.f32 %v283_v29, 0.0  ;;  %v393_v51 = vmax.f32 %v347_v44, 0.0 }
  0xf3   :  { %v375_v42 = vmax.f32 %v275_v34, 0.0  ;;  %v391_v54 = vmax.f32 %v339_v48, 0.0 }
  0xf4   :  { %v403_v46 = vpack.c.bf16 %v377_v38, %v376_v37  ;;  %v411_v57 = vpack.c.bf16 %v393_v51, %v392_v43 }
  0xf5   :  { %v402_v49 = vpack.c.bf16 %v375_v42, %v374_v41  ;;  %v1093_v50 = vpop.f32.mrb[12].mxu0  ;;  %v410_v60 = vpack.c.bf16 %v391_v54, %v390_v47  ;;  %v1109_v61 = vpop.f32.mrb[12].mxu1 }
  0xf6   :  { %v296_v52 = vadd.f32 %v1093_v50, %v1390_v32  ;;  %v287_v53 = vpop.f32.mrb[13].mxu0  ;;  %v360_v63 = vadd.f32 %v1109_v61, %v1390_v32  ;;  %v351_v1 = vpop.f32.mrb[13].mxu1 }
  0xf7   :  { %v288_v55 = vadd.f32 %v1390_v32, %v287_v53  ;;  %v1094_v56 = vpop.f32.mrb[14].mxu0  ;;  %1135 = vmatprep.mubr.bf16.mxu1 %v402_v49  ;;  %v352_v5 = vadd.f32 %v1390_v32, %v351_v1  ;;  %v1110_v6 = vpop.f32.mrb[14].mxu1 }
  0xf8   :  { %v299_v58 = vadd.f32 %v1094_v56, %v1390_v32  ;;  %v290_v59 = vpop.f32.mrb[15].mxu0  ;;  %1136 = vmatmul.mubr.bf16.gmra.mrb[24].mxu1 %v403_v46  ;;  %v380_v2 = vmax.f32 %v296_v52, 0.0  ;;  %v396_v9 = vmax.f32 %v360_v63, 0.0  ;;  %v363_v10 = vadd.f32 %v1110_v6, %v1390_v32  ;;  %v354_v11 = vpop.f32.mrb[15].mxu1 }
  0xf9   :  { %v291_v62 = vadd.f32 %v1390_v32, %v290_v59  ;;  %v378_v7 = vmax.f32 %v288_v55, 0.0  ;;  %v394_v13 = vmax.f32 %v352_v5, 0.0  ;;  %v355_v14 = vadd.f32 %v1390_v32, %v354_v11  ;;  %v1243_v32 = vld [vmem:[%s1609_s3 + $0x30] sm:$0xff]  }
  0xfa   :  { %v381_v4 = vmax.f32 %v299_v58, 0.0  ;;  %v397_v16 = vmax.f32 %v363_v10, 0.0  ;;  %1171 = vmatprep.subr.bf16.mxu0 %v1243_v32 }
  0xfb   :  { %v379_v8 = vmax.f32 %v291_v62, 0.0  ;;  %v395_v17 = vmax.f32 %v355_v14, 0.0  ;;  %1172 = vmatpush3.bf16.msra.mxu0 %v1243_v32 }
  0xfc   :  { %v405_v12 = vpack.c.bf16 %v381_v4, %v380_v2  ;;  %v413_v18 = vpack.c.bf16 %v397_v16, %v396_v9  ;;  %1173 = vmatprep.subr.bf16.mxu0 %v1244_v20 }
  0xfd   :  { %v404_v15 = vpack.c.bf16 %v379_v8, %v378_v7  ;;  %v412_v19 = vpack.c.bf16 %v395_v17, %v394_v13 }
  0xff   :  { %1139 = vmatprep.mubr.bf16.mxu1 %v404_v15  ;;  %1174 = vmatpush3.bf16.msra.mxu0 %v1244_v20 }
 0x100   :  { %1140 = vmatmul.mubr.bf16.gmra.mrb[28].mxu1 %v405_v12 }
 0x101   :  { %1143 = vmatprep.mubr.bf16.mxu1 %v1405_v3 }
 0x108   :  { %1144 = vmatmul.mubr.bf16.gmra.mrb[32].mxu1 %v1402_v0  ;;  %v1439_v0 = vld [vmem:[%s1610_s4 + $0x1] ss:$0 sm:$0xff] }
 0x109   :  { %1147 = vmatprep.mubr.bf16.mxu1 %v408_v31 }
 0x110   :  { %1148 = vmatmul.mubr.bf16.gmra.mrb[36].mxu1 %v409_v28 }
 0x111   :  { %1151 = vmatprep.mubr.bf16.mxu1 %v410_v60 }
 0x118   :  { %1152 = vmatmul.mubr.bf16.gmra.mrb[40].mxu1 %v411_v57 }
 0x119   :  { %1155 = vmatprep.mubr.bf16.mxu1 %v412_v19 }
 0x120   :  { %1156 = vmatmul.mubr.bf16.gmra.mrb[44].mxu1 %v413_v18 }
 0x1bb   :  { %v1129_v3 = vpop.f32.mrb[16].mxu1 }
 0x1bc   :  { %v525_v21 = vadd.f32 %v1129_v3, %v1439_v0  ;;  %v516_v22 = vpop.f32.mrb[17].mxu1 }
 0x1bd   :  { %v517_v23 = vadd.f32 %v1439_v0, %v516_v22  ;;  %v1130_v24 = vpop.f32.mrb[18].mxu1 }
 0x1be   :  { %v528_v25 = vadd.f32 %v1130_v24, %v1439_v0  ;;  %v519_v26 = vpop.f32.mrb[19].mxu1  ;;  %v645_v28 = vmax.f32 %v525_v21, 0.0 }
 0x1bf   :  { %v520_v27 = vadd.f32 %v1439_v0, %v519_v26  ;;  %v643_v30 = vmax.f32 %v517_v23, 0.0 }
 0x1c0   :  { %v646_v29 = vmax.f32 %v528_v25, 0.0 }
 0x1c1   :  { %v644_v31 = vmax.f32 %v520_v27, 0.0 }
 0x1c2   :  { %v676_v33 = vpack.c.bf16 %v646_v29, %v645_v28 }
 0x1c3   :  { %v675_v34 = vpack.c.bf16 %v644_v31, %v643_v30  ;;  %v1133_v35 = vpop.f32.mrb[20].mxu1 }
 0x1c4   :  { %v541_v36 = vadd.f32 %v1133_v35, %v1439_v0  ;;  %v532_v37 = vpop.f32.mrb[21].mxu1 }
 0x1c5   :  { %v533_v38 = vadd.f32 %v1439_v0, %v532_v37  ;;  %v1134_v39 = vpop.f32.mrb[22].mxu1  ;;  %1175 = vmatprep.mubr.bf16.mxu0 %v675_v34 }
 0x1c6   :  { %v544_v40 = vadd.f32 %v1134_v39, %v1439_v0  ;;  %v535_v41 = vpop.f32.mrb[23].mxu1  ;;  %1176 = vmatmul.mubr.bf16.vlgmr.msra.gmra.mrb[16].mxu0 %v676_v33  ;;  %v649_v43 = vmax.f32 %v541_v36, 0.0 }
 0x1c7   :  { %v536_v42 = vadd.f32 %v1439_v0, %v535_v41  ;;  %v647_v45 = vmax.f32 %v533_v38, 0.0 }
 0x1c8   :  { %v650_v44 = vmax.f32 %v544_v40, 0.0 }
 0x1c9   :  { %v648_v46 = vmax.f32 %v536_v42, 0.0 }
 0x1ca   :  { %v678_v47 = vpack.c.bf16 %v650_v44, %v649_v43 }
 0x1cb   :  { %v677_v48 = vpack.c.bf16 %v648_v46, %v647_v45  ;;  %v1137_v49 = vpop.f32.mrb[24].mxu1 }
 0x1cc   :  { %v557_v50 = vadd.f32 %v1137_v49, %v1439_v0  ;;  %v548_v51 = vpop.f32.mrb[25].mxu1 }
 0x1cd   :  { %v549_v52 = vadd.f32 %v1439_v0, %v548_v51  ;;  %v1138_v53 = vpop.f32.mrb[26].mxu1  ;;  %1179 = vmatprep.mubr.bf16.mxu0 %v677_v48 }
 0x1ce   :  { %v560_v54 = vadd.f32 %v1138_v53, %v1439_v0  ;;  %v551_v55 = vpop.f32.mrb[27].mxu1  ;;  %1180 = vmatmul.mubr.bf16.gmra.mrb[20].mxu0 %v678_v47  ;;  %v653_v57 = vmax.f32 %v557_v50, 0.0 }
 0x1cf   :  { %v552_v56 = vadd.f32 %v1439_v0, %v551_v55  ;;  %v651_v59 = vmax.f32 %v549_v52, 0.0 }
 0x1d0   :  { %v654_v58 = vmax.f32 %v560_v54, 0.0 }
 0x1d1   :  { %v652_v60 = vmax.f32 %v552_v56, 0.0 }
 0x1d2   :  { %v680_v61 = vpack.c.bf16 %v654_v58, %v653_v57 }
 0x1d3   :  { %v679_v62 = vpack.c.bf16 %v652_v60, %v651_v59  ;;  %v1141_v63 = vpop.f32.mrb[28].mxu1 }
 0x1d4   :  { %v573_v1 = vadd.f32 %v1141_v63, %v1439_v0  ;;  %v564_v2 = vpop.f32.mrb[29].mxu1 }
 0x1d5   :  { %v565_v4 = vadd.f32 %v1439_v0, %v564_v2  ;;  %v1142_v5 = vpop.f32.mrb[30].mxu1  ;;  %1183 = vmatprep.mubr.bf16.mxu0 %v679_v62 }
 0x1d6   :  { %v576_v6 = vadd.f32 %v1142_v5, %v1439_v0  ;;  %v567_v7 = vpop.f32.mrb[31].mxu1  ;;  %1184 = vmatmul.mubr.bf16.gmra.mrb[24].mxu0 %v680_v61  ;;  %v657_v9 = vmax.f32 %v573_v1, 0.0 }
 0x1d7   :  { %v568_v8 = vadd.f32 %v1439_v0, %v567_v7  ;;  %v655_v11 = vmax.f32 %v565_v4, 0.0 }
 0x1d8   :  { %v658_v10 = vmax.f32 %v576_v6, 0.0 }
 0x1d9   :  { %v656_v12 = vmax.f32 %v568_v8, 0.0  ;;  %v1476_v8 = vld [vmem:[%s1610_s4 + $0x2] ss:$0 sm:$0xff] }
 0x1da   :  { %v682_v13 = vpack.c.bf16 %v658_v10, %v657_v9 }
 0x1db   :  { %v681_v14 = vpack.c.bf16 %v656_v12, %v655_v11  ;;  %v1145_v15 = vpop.f32.mrb[32].mxu1 }
 0x1dc   :  { %v589_v16 = vadd.f32 %v1145_v15, %v1439_v0  ;;  %v580_v17 = vpop.f32.mrb[33].mxu1 }
 0x1dd   :  { %v581_v18 = vadd.f32 %v1439_v0, %v580_v17  ;;  %v1146_v19 = vpop.f32.mrb[34].mxu1  ;;  %1187 = vmatprep.mubr.bf16.mxu0 %v681_v14 }
 0x1de   :  { %v592_v32 = vadd.f32 %v1146_v19, %v1439_v0  ;;  %v583_v20 = vpop.f32.mrb[35].mxu1  ;;  %1188 = vmatmul.mubr.bf16.gmra.mrb[28].mxu0 %v682_v13  ;;  %v661_v21 = vmax.f32 %v589_v16, 0.0 }
 0x1df   :  { %v584_v3 = vadd.f32 %v1439_v0, %v583_v20  ;;  %v659_v23 = vmax.f32 %v581_v18, 0.0 }
 0x1e0   :  { %v662_v22 = vmax.f32 %v592_v32, 0.0 }
 0x1e1   :  { %v660_v24 = vmax.f32 %v584_v3, 0.0 }
 0x1e2   :  { %v684_v25 = vpack.c.bf16 %v662_v22, %v661_v21 }
 0x1e3   :  { %v683_v26 = vpack.c.bf16 %v660_v24, %v659_v23  ;;  %v1149_v27 = vpop.f32.mrb[36].mxu1 }
 0x1e4   :  { %v605_v28 = vadd.f32 %v1149_v27, %v1439_v0  ;;  %v596_v29 = vpop.f32.mrb[37].mxu1 }
 0x1e5   :  { %v597_v30 = vadd.f32 %v1439_v0, %v596_v29  ;;  %v1150_v31 = vpop.f32.mrb[38].mxu1  ;;  %1191 = vmatprep.mubr.bf16.mxu0 %v683_v26 }
 0x1e6   :  { %v608_v33 = vadd.f32 %v1150_v31, %v1439_v0  ;;  %v599_v34 = vpop.f32.mrb[39].mxu1  ;;  %1192 = vmatmul.mubr.bf16.gmra.mrb[32].mxu0 %v684_v25  ;;  %v665_v36 = vmax.f32 %v605_v28, 0.0 }
 0x1e7   :  { %v600_v35 = vadd.f32 %v1439_v0, %v599_v34  ;;  %v663_v38 = vmax.f32 %v597_v30, 0.0 }
 0x1e8   :  { %v666_v37 = vmax.f32 %v608_v33, 0.0 }
 0x1e9   :  { %v664_v39 = vmax.f32 %v600_v35, 0.0 }
 0x1ea   :  { %v686_v40 = vpack.c.bf16 %v666_v37, %v665_v36 }
 0x1eb   :  { %v685_v41 = vpack.c.bf16 %v664_v39, %v663_v38  ;;  %v1153_v42 = vpop.f32.mrb[40].mxu1 }
 0x1ec   :  { %v621_v43 = vadd.f32 %v1153_v42, %v1439_v0  ;;  %v612_v44 = vpop.f32.mrb[41].mxu1 }
 0x1ed   :  { %v613_v45 = vadd.f32 %v1439_v0, %v612_v44  ;;  %v1154_v46 = vpop.f32.mrb[42].mxu1  ;;  %1195 = vmatprep.mubr.bf16.mxu0 %v685_v41 }
 0x1ee   :  { %v624_v47 = vadd.f32 %v1154_v46, %v1439_v0  ;;  %v615_v48 = vpop.f32.mrb[43].mxu1  ;;  %1196 = vmatmul.mubr.bf16.gmra.mrb[36].mxu0 %v686_v40  ;;  %v669_v50 = vmax.f32 %v621_v43, 0.0 }
 0x1ef   :  { %v616_v49 = vadd.f32 %v1439_v0, %v615_v48  ;;  %v667_v52 = vmax.f32 %v613_v45, 0.0 }
 0x1f0   :  { %v670_v51 = vmax.f32 %v624_v47, 0.0 }
 0x1f1   :  { %v668_v53 = vmax.f32 %v616_v49, 0.0 }
 0x1f2   :  { %v688_v54 = vpack.c.bf16 %v670_v51, %v669_v50 }
 0x1f3   :  { %v687_v55 = vpack.c.bf16 %v668_v53, %v667_v52  ;;  %v1157_v56 = vpop.f32.mrb[44].mxu1 }
 0x1f4   :  { %v637_v57 = vadd.f32 %v1157_v56, %v1439_v0  ;;  %v628_v58 = vpop.f32.mrb[45].mxu1 }
 0x1f5   :  { %v629_v59 = vadd.f32 %v1439_v0, %v628_v58  ;;  %v1158_v60 = vpop.f32.mrb[46].mxu1  ;;  %1199 = vmatprep.mubr.bf16.mxu0 %v687_v55 }
 0x1f6   :  { %v640_v61 = vadd.f32 %v1158_v60, %v1439_v0  ;;  %v631_v62 = vpop.f32.mrb[47].mxu1  ;;  %1200 = vmatmul.mubr.bf16.gmra.mrb[40].mxu0 %v688_v54  ;;  %v673_v1 = vmax.f32 %v637_v57, 0.0 }
 0x1f7   :  { %v632_v63 = vadd.f32 %v1439_v0, %v631_v62  ;;  %v671_v4 = vmax.f32 %v629_v59, 0.0 }
 0x1f8   :  { %v674_v2 = vmax.f32 %v640_v61, 0.0 }
 0x1f9   :  { %v672_v5 = vmax.f32 %v632_v63, 0.0 }
 0x1fa   :  { %v690_v6 = vpack.c.bf16 %v674_v2, %v673_v1 }
 0x1fb   :  { %v689_v7 = vpack.c.bf16 %v672_v5, %v671_v4 }
 0x1fd   :  { %1203 = vmatprep.mubr.bf16.mxu0 %v689_v7 }
 0x1fe   :  { %1204 = vmatmul.mubr.bf16.gmra.mrb[44].mxu0 %v690_v6 }
 0x299   :  { %v1177_v9 = vpop.f32.mrb[16].mxu0 }
 0x29a   :  { %v802_v10 = vadd.f32 %v1177_v9, %v1476_v8  ;;  %v793_v11 = vpop.f32.mrb[17].mxu0 }
 0x29b   :  { %v794_v12 = vadd.f32 %v1476_v8, %v793_v11  ;;  %v1178_v0 = vpop.f32.mrb[18].mxu0 }
 0x29c   :  { %922 = vst [vmem:[%s1611_s5 + $0x10] sm:$0xff] %v802_v10  ;;  %v805_v13 = vadd.f32 %v1178_v0, %v1476_v8  ;;  %v796_v14 = vpop.f32.mrb[19].mxu0 }
 0x29d   :  { %920 = vst [vmem:[%s1611_s5] sm:$0xff] %v794_v12  ;;  %v797_v15 = vadd.f32 %v1476_v8, %v796_v14 }
 0x29e   :  { %923 = vst [vmem:[%s1611_s5 + $0x18] sm:$0xff] %v805_v13 }
 0x29f   :  { %921 = vst [vmem:[%s1611_s5 + $0x8] sm:$0xff] %v797_v15 }
 0x2a1   :  { %v1181_v16 = vpop.f32.mrb[20].mxu0 }
 0x2a2   :  { %v818_v17 = vadd.f32 %v1181_v16, %v1476_v8  ;;  %v809_v18 = vpop.f32.mrb[21].mxu0 }
 0x2a3   :  { %v810_v19 = vadd.f32 %v1476_v8, %v809_v18  ;;  %v1182_v32 = vpop.f32.mrb[22].mxu0 }
 0x2a4   :  { %926 = vst [vmem:[%s1611_s5 + $0x30] sm:$0xff] %v818_v17  ;;  %v821_v20 = vadd.f32 %v1182_v32, %v1476_v8  ;;  %v812_v3 = vpop.f32.mrb[23].mxu0 }
 0x2a5   :  { %924 = vst [vmem:[%s1611_s5 + $0x20] sm:$0xff] %v810_v19  ;;  %v813_v21 = vadd.f32 %v1476_v8, %v812_v3 }
 0x2a6   :  { %927 = vst [vmem:[%s1611_s5 + $0x38] sm:$0xff] %v821_v20 }
 0x2a7   :  { %925 = vst [vmem:[%s1611_s5 + $0x28] sm:$0xff] %v813_v21 }
 0x2a9   :  { %v1185_v22 = vpop.f32.mrb[24].mxu0 }
 0x2aa   :  { %v834_v23 = vadd.f32 %v1185_v22, %v1476_v8  ;;  %v825_v24 = vpop.f32.mrb[25].mxu0 }
 0x2ab   :  { %v826_v25 = vadd.f32 %v1476_v8, %v825_v24  ;;  %v1186_v26 = vpop.f32.mrb[26].mxu0 }
 0x2ac   :  { %930 = vst [vmem:[%s1611_s5 + $0x50] sm:$0xff] %v834_v23  ;;  %v837_v27 = vadd.f32 %v1186_v26, %v1476_v8  ;;  %v828_v28 = vpop.f32.mrb[27].mxu0 }
 0x2ad   :  { %928 = vst [vmem:[%s1611_s5 + $0x40] sm:$0xff] %v826_v25  ;;  %v829_v29 = vadd.f32 %v1476_v8, %v828_v28 }
 0x2ae   :  { %931 = vst [vmem:[%s1611_s5 + $0x58] sm:$0xff] %v837_v27 }
 0x2af   :  { %929 = vst [vmem:[%s1611_s5 + $0x48] sm:$0xff] %v829_v29 }
 0x2b1   :  { %v1189_v30 = vpop.f32.mrb[28].mxu0 }
 0x2b2   :  { %v850_v31 = vadd.f32 %v1189_v30, %v1476_v8  ;;  %v841_v33 = vpop.f32.mrb[29].mxu0 }
 0x2b3   :  { %v842_v34 = vadd.f32 %v1476_v8, %v841_v33  ;;  %v1190_v35 = vpop.f32.mrb[30].mxu0 }
 0x2b4   :  { %934 = vst [vmem:[%s1611_s5 + $0x70] sm:$0xff] %v850_v31  ;;  %v853_v36 = vadd.f32 %v1190_v35, %v1476_v8  ;;  %v844_v37 = vpop.f32.mrb[31].mxu0 }
 0x2b5   :  { %932 = vst [vmem:[%s1611_s5 + $0x60] sm:$0xff] %v842_v34  ;;  %v845_v38 = vadd.f32 %v1476_v8, %v844_v37 }
 0x2b6   :  { %935 = vst [vmem:[%s1611_s5 + $0x78] sm:$0xff] %v853_v36 }
 0x2b7   :  { %933 = vst [vmem:[%s1611_s5 + $0x68] sm:$0xff] %v845_v38 }
 0x2b9   :  { %v1193_v39 = vpop.f32.mrb[32].mxu0 }
 0x2ba   :  { %v866_v40 = vadd.f32 %v1193_v39, %v1476_v8  ;;  %v857_v41 = vpop.f32.mrb[33].mxu0 }
 0x2bb   :  { %v858_v42 = vadd.f32 %v1476_v8, %v857_v41  ;;  %v1194_v43 = vpop.f32.mrb[34].mxu0 }
 0x2bc   :  { %938 = vst [vmem:[%s1611_s5 + $0x90] sm:$0xff] %v866_v40  ;;  %v869_v44 = vadd.f32 %v1194_v43, %v1476_v8  ;;  %v860_v45 = vpop.f32.mrb[35].mxu0 }
 0x2bd   :  { %936 = vst [vmem:[%s1611_s5 + $0x80] sm:$0xff] %v858_v42  ;;  %v861_v46 = vadd.f32 %v1476_v8, %v860_v45 }
 0x2be   :  { %939 = vst [vmem:[%s1611_s5 + $0x98] sm:$0xff] %v869_v44 }
 0x2bf   :  { %937 = vst [vmem:[%s1611_s5 + $0x88] sm:$0xff] %v861_v46 }
 0x2c1   :  { %v1197_v47 = vpop.f32.mrb[36].mxu0 }
 0x2c2   :  { %v882_v48 = vadd.f32 %v1197_v47, %v1476_v8  ;;  %v873_v49 = vpop.f32.mrb[37].mxu0 }
 0x2c3   :  { %v874_v50 = vadd.f32 %v1476_v8, %v873_v49  ;;  %v1198_v51 = vpop.f32.mrb[38].mxu0 }
 0x2c4   :  { %942 = vst [vmem:[%s1611_s5 + $0xb0] sm:$0xff] %v882_v48  ;;  %v885_v52 = vadd.f32 %v1198_v51, %v1476_v8  ;;  %v876_v53 = vpop.f32.mrb[39].mxu0 }
 0x2c5   :  { %940 = vst [vmem:[%s1611_s5 + $0xa0] sm:$0xff] %v874_v50  ;;  %v877_v54 = vadd.f32 %v1476_v8, %v876_v53 }
 0x2c6   :  { %943 = vst [vmem:[%s1611_s5 + $0xb8] sm:$0xff] %v885_v52 }
 0x2c7   :  { %941 = vst [vmem:[%s1611_s5 + $0xa8] sm:$0xff] %v877_v54 }
 0x2c9   :  { %v1201_v55 = vpop.f32.mrb[40].mxu0 }
 0x2ca   :  { %v898_v56 = vadd.f32 %v1201_v55, %v1476_v8  ;;  %v889_v57 = vpop.f32.mrb[41].mxu0 }
 0x2cb   :  { %v890_v58 = vadd.f32 %v1476_v8, %v889_v57  ;;  %v1202_v59 = vpop.f32.mrb[42].mxu0 }
 0x2cc   :  { %946 = vst [vmem:[%s1611_s5 + $0xd0] sm:$0xff] %v898_v56  ;;  %v901_v60 = vadd.f32 %v1202_v59, %v1476_v8  ;;  %v892_v61 = vpop.f32.mrb[43].mxu0 }
 0x2cd   :  { %944 = vst [vmem:[%s1611_s5 + $0xc0] sm:$0xff] %v890_v58  ;;  %v893_v62 = vadd.f32 %v1476_v8, %v892_v61 }
 0x2ce   :  { %947 = vst [vmem:[%s1611_s5 + $0xd8] sm:$0xff] %v901_v60 }
 0x2cf   :  { %945 = vst [vmem:[%s1611_s5 + $0xc8] sm:$0xff] %v893_v62 }
 0x2d1   :  { %v1205_v63 = vpop.f32.mrb[44].mxu0 }
 0x2d2   :  { %v914_v1 = vadd.f32 %v1205_v63, %v1476_v8  ;;  %v905_v2 = vpop.f32.mrb[45].mxu0 }
 0x2d3   :  { %v906_v4 = vadd.f32 %v1476_v8, %v905_v2  ;;  %v1206_v5 = vpop.f32.mrb[46].mxu0 }
 0x2d4   :  { %950 = vst [vmem:[%s1611_s5 + $0xf0] sm:$0xff] %v914_v1  ;;  %v917_v6 = vadd.f32 %v1206_v5, %v1476_v8  ;;  %v908_v7 = vpop.f32.mrb[47].mxu0 }
 0x2d5   :  { %948 = vst [vmem:[%s1611_s5 + $0xe0] sm:$0xff] %v906_v4  ;;  %v909_v9 = vadd.f32 %v1476_v8, %v908_v7 }
 0x2d6   :  { %951 = vst [vmem:[%s1611_s5 + $0xf8] sm:$0xff] %v917_v6 }
 0x2d7   :  { %949 = vst [vmem:[%s1611_s5 + $0xe8] sm:$0xff] %v909_v9 }

</bundles_post_ra>
